<compile_context>
chip_gen: v6e
topology: v6e:2x2x1
jax: 0.10.0
libtpu: 0.0.40
codegen_flags: <defaults>
</compile_context>

<pallas_src>
import functools

import jax
import jax.numpy as jnp
from jax.experimental import pallas as pl
from jax.experimental.pallas import tpu as pltpu


_VMEM_LIMIT_BYTES = 32 * 1024 * 1024    # scoped-VMEM request, safe on v5e/v6e/v7x
_BLOCK_BUDGET_BYTES = 2 * 1024 * 1024   # native bytes per input block / channel slab

_PARALLEL = getattr(pltpu, "PARALLEL", "parallel")
_ARBITRARY = getattr(pltpu, "ARBITRARY", "arbitrary")
_CORE_PARALLEL = getattr(pltpu, "CORE_PARALLEL", _PARALLEL)


# ---------------------------------------------------------------------------
# Kernels
# ---------------------------------------------------------------------------

def _fused_norm_scale_kernel(x_ref, w_ref, o_ref, norm_ref, *, sqrt_frac, eps):
    """One resident (N, c_tile, L) channel slab: norm + scale in a single pass."""
    x = x_ref[...].astype(jnp.float32)                             # promote once
    ss = jnp.sum(jnp.sum(x * x, axis=2, keepdims=True), axis=0)    # (c_tile, 1)
    norm = jnp.sqrt(ss)                                            # (c_tile, 1)
    norm_ref[...] = norm
    scale = w_ref[...] / (norm / sqrt_frac + eps)                  # (c_tile, 1) f32
    o_ref[...] = (x * scale[None, :, :]).astype(o_ref.dtype)       # round once


def _row_sumsq_kernel(x_ref, ss_ref, *, lane_groups):
    """Accumulate per-row sum of x^2 into 128 lane buckets (resident f32 block)."""
    @pl.when(pl.program_id(1) == 0)
    def _():
        ss_ref[...] = jnp.zeros_like(ss_ref)
    x = x_ref[...].astype(jnp.float32)
    x2 = x * x
    part = x2[:, 0:128]
    for g in range(1, lane_groups):                 # static unroll, pure VPU adds
        part = part + x2[:, g * 128:(g + 1) * 128]
    ss_ref[...] += part


def _row_scale_kernel(x_ref, s_ref, o_ref):
    """out = x * per-row f32 scale; promote-then-round (single cast on store)."""
    x = x_ref[...].astype(jnp.float32)
    o_ref[...] = (x * s_ref[...]).astype(o_ref.dtype)


# ---------------------------------------------------------------------------
# Tiling / dispatch helpers
# ---------------------------------------------------------------------------

def _fused_channel_tile(N, C, L, itemsize):
    """Largest c_tile (divides C; multiple of 8 or == C) whose (N, c_tile, L)
    slab fits the per-block byte budget; None -> use the two-phase fallback."""
    slab1 = N * L * itemsize
    cands = sorted({C} | {t for t in range(8, C, 8) if C % t == 0})
    best = None
    for t in cands:
        if t * slab1 <= _BLOCK_BUDGET_BYTES:
            best = t
    return best


def _largest_divisor_tile(dim, base, cap):
    """Largest multiple of `base` dividing `dim` and <= cap (needs dim % base == 0)."""
    best = base
    t = base
    while t <= min(dim, cap):
        if dim % t == 0:
            best = t
        t += base
    return best


def _two_phase_tiles(R, L, itemsize):
    lane_cap = 4096 if itemsize <= 2 else 2048          # ~2 MiB lane-wide blocks
    l_tile = _largest_divisor_tile(L, 128, lane_cap)
    r_cap = max(8, (_BLOCK_BUDGET_BYTES // (l_tile * itemsize)) // 8 * 8)
    r_tile = _largest_divisor_tile(R, 8, r_cap)
    return r_tile, l_tile


def _call_with_megacore(build, *args):
    """Try CORE_PARALLEL sharding of the data-parallel grid axis (v7x: 2 TCs per
    chip); fall back to plain "parallel" if the compiler rejects it."""
    try:
        return jax.block_until_ready(build(_CORE_PARALLEL)(*args))
    except Exception:
        return build(_PARALLEL)(*args)


# ---------------------------------------------------------------------------
# Two-phase fallback (channel slab too large for VMEM)
# ---------------------------------------------------------------------------

def _two_phase_norm(x2d, N, C, L, R, itemsize):
    """Per-channel L2 norm via a tiled streaming reduce over the (N*C, L) view."""
    if R % 8 != 0 or L % 128 != 0:
        # TODO(synk): masked-tail Pallas kernels for non-(8,128)-divisible shapes;
        # plain XLA keeps it correct without risking giant full-dim VMEM blocks.
        ss = jnp.sum(jnp.square(x2d.astype(jnp.float32)), axis=1)
        return jnp.sqrt(ss.reshape(N, C).sum(axis=0))

    r_tile, l_tile = _two_phase_tiles(R, L, itemsize)
    gr, gl = R // r_tile, L // l_tile

    def build(row_sem):
        return pl.pallas_call(
            functools.partial(_row_sumsq_kernel, lane_groups=l_tile // 128),
            out_shape=jax.ShapeDtypeStruct((R, 128), jnp.float32),
            grid=(gr, gl),
            in_specs=[pl.BlockSpec((r_tile, l_tile), lambda i, j: (i, j))],
            out_specs=pl.BlockSpec((r_tile, 128), lambda i, j: (i, 0)),
            compiler_params=pltpu.CompilerParams(
                dimension_semantics=(row_sem, _ARBITRARY),
                vmem_limit_bytes=_VMEM_LIMIT_BYTES),
            cost_estimate=pl.CostEstimate(
                flops=2 * R * L, transcendentals=0,
                bytes_accessed=R * L * itemsize + R * 128 * 4),
        )

    row_ls = _call_with_megacore(build, x2d)                 # (R, 128) lane buckets
    sumsq_c = row_ls.sum(axis=1).reshape(N, C).sum(axis=0)   # tiny JAX fold
    return jnp.sqrt(sumsq_c)                                 # (C,) f32


def _apply_row_scale(x2d, scale_row, R, L, itemsize):
    """out2d = x2d * scale_row (per-row f32 scale), streamed in (8,128) tiles."""
    if R % 8 != 0 or L % 128 != 0:
        # TODO(synk): masked-tail Pallas kernel for non-(8,128)-divisible shapes.
        return (x2d.astype(jnp.float32) * scale_row).astype(x2d.dtype)

    r_tile, l_tile = _two_phase_tiles(R, L, itemsize)
    gr, gl = R // r_tile, L // l_tile

    def build(row_sem):
        return pl.pallas_call(
            _row_scale_kernel,
            out_shape=jax.ShapeDtypeStruct((R, L), x2d.dtype),
            grid=(gr, gl),
            in_specs=[pl.BlockSpec((r_tile, l_tile), lambda i, j: (i, j)),
                      pl.BlockSpec((r_tile, 1), lambda i, j: (i, 0))],
            out_specs=pl.BlockSpec((r_tile, l_tile), lambda i, j: (i, j)),
            compiler_params=pltpu.CompilerParams(
                dimension_semantics=(row_sem, _PARALLEL),
                vmem_limit_bytes=_VMEM_LIMIT_BYTES),
            cost_estimate=pl.CostEstimate(
                flops=R * L, transcendentals=0,
                bytes_accessed=2 * R * L * itemsize + R * 4),
        )

    return _call_with_megacore(build, x2d, scale_row)


# ---------------------------------------------------------------------------
# Public forward
# ---------------------------------------------------------------------------

def batchnorm2d_scaling_rms(x_nchw, weight, running_norm, *, eps=1e-5,
                            momentum=0.1, training=True, num_batches_tracked=0):
    """Forward of BatchNorm2dScalingRMS.

    Args:
      x_nchw:              (N, C, H, W) input.
      weight:              (C,) affine scale, or None (affine=False).
      running_norm:        (C,) running L2-norm buffer, or None
                           (track_running_stats=False).
      eps, momentum:       as in the module (momentum may be None -> cumulative
                           average using num_batches_tracked).
      training:            module training flag.
      num_batches_tracked: current counter value (used when momentum is None).

    Returns:
      (out, new_running_norm, new_num_batches_tracked)
    """
    N, C, H, W = x_nchw.shape
    L = H * W
    R = N * C
    frac = float(N * H * W)
    sqrt_frac = frac ** 0.5
    itemsize = jnp.dtype(x_nchw.dtype).itemsize

    track = running_norm is not None
    bn_training = training or not track

    weight_f32 = (jnp.ones((C,), jnp.float32) if weight is None
                  else weight.reshape(C).astype(jnp.float32))

    # num_batches_tracked update and exponential-average factor.
    if training and track:
        new_nbt = num_batches_tracked + 1
        eaf = (1.0 / new_nbt) if momentum is None else momentum
    else:
        new_nbt = num_batches_tracked
        eaf = 0.0 if momentum is None else momentum

    c_tile = _fused_channel_tile(N, C, L, itemsize)

    if bn_training and c_tile is not None:
        # ------- Fused single pass over channel slabs (main path) ----------
        x3 = x_nchw.reshape(N, C, L)                  # free, contiguous view
        w_col = weight_f32.reshape(C, 1)
        grid_c = C // c_tile

        def build(row_sem):
            return pl.pallas_call(
                functools.partial(_fused_norm_scale_kernel,
                                  sqrt_frac=sqrt_frac, eps=eps),
                out_shape=(jax.ShapeDtypeStruct((N, C, L), x_nchw.dtype),
                           jax.ShapeDtypeStruct((C, 1), jnp.float32)),
                grid=(grid_c,),
                in_specs=[pl.BlockSpec((N, c_tile, L), lambda c: (0, c, 0)),
                          pl.BlockSpec((c_tile, 1), lambda c: (c, 0))],
                out_specs=(pl.BlockSpec((N, c_tile, L), lambda c: (0, c, 0)),
                           pl.BlockSpec((c_tile, 1), lambda c: (c, 0))),
                compiler_params=pltpu.CompilerParams(
                    dimension_semantics=(row_sem,),
                    vmem_limit_bytes=_VMEM_LIMIT_BYTES),
                cost_estimate=pl.CostEstimate(
                    flops=3 * x_nchw.size, transcendentals=C,
                    bytes_accessed=2 * x_nchw.size * itemsize + 8 * C),
            )

        out3, norm_col = _call_with_megacore(build, x3, w_col)
        out = out3.reshape(N, C, H, W)
        norm_c = norm_col.reshape(C)
    else:
        # ------- Two-phase fallback (channel slab too big for VMEM) --------
        x2d = x_nchw.reshape(R, L)
        if bn_training:
            norm_c = _two_phase_norm(x2d, N, C, L, R, itemsize)
        else:
            norm_c = running_norm.reshape(C).astype(jnp.float32)
        scale_c = weight_f32 / (norm_c / sqrt_frac + eps)          # (C,) f32
        scale_row = jnp.broadcast_to(scale_c[None, :], (N, C)).reshape(R, 1)
        out = _apply_row_scale(x2d, scale_row, R, L, itemsize).reshape(N, C, H, W)

    if bn_training and track:
        new_rn = ((1.0 - eaf) * running_norm.reshape(C).astype(jnp.float32)
                  + eaf * norm_c).astype(running_norm.dtype)
    else:
        new_rn = running_norm
    return out, new_rn, new_nbt


# ---------------------------------------------------------------------------
# Pure-JAX reference and self-test
# ---------------------------------------------------------------------------

def _reference(x, weight, running_norm, eps, momentum, training=True, nbt=0):
    frac = float(x.shape[0] * x.shape[2] * x.shape[3])
    xf = x.astype(jnp.float32)
    if training or running_norm is None:
        norm = jnp.sqrt(jnp.sum(xf * xf, axis=(0, 2, 3), keepdims=True))
    else:
        norm = running_norm.reshape(1, -1, 1, 1).astype(jnp.float32)
    out = xf / (norm / frac ** 0.5 + eps)
    if weight is not None:
        out = weight.reshape(1, -1, 1, 1).astype(jnp.float32) * out
    out = out.astype(x.dtype)
    new_rn, new_nbt = running_norm, nbt
    if training and running_norm is not None:
        new_nbt = nbt + 1
        eaf = (1.0 / new_nbt) if momentum is None else momentum
        new_rn = ((1.0 - eaf) * running_norm.astype(jnp.float32)
                  + eaf * norm.reshape(-1)).astype(running_norm.dtype)
    return out, new_rn, new_nbt


if __name__ == "__main__":
    key = jax.random.PRNGKey(0)
    k1, k2 = jax.random.split(key)

    # Case 1: small shape -> fused single-pass kernel path.
    N, C, H, W = 2, 4, 16, 16
    x = jax.random.normal(k1, (N, C, H, W), dtype=jnp.float32)
    weight = jnp.linspace(0.5, 1.5, C, dtype=jnp.float32)
    running_norm = jnp.ones((C,), dtype=jnp.float32)      # reset_running_stats()

    out, new_rn, new_nbt = batchnorm2d_scaling_rms(
        x, weight, running_norm, eps=1e-5, momentum=0.1, training=True,
        num_batches_tracked=0)
    out, new_rn = jax.block_until_ready((out, new_rn))

    ref_out, ref_rn, ref_nbt = _reference(x, weight, running_norm, 1e-5, 0.1)
    assert out.shape == (N, C, H, W)
    assert int(new_nbt) == int(ref_nbt) == 1
    assert jnp.allclose(out, ref_out, atol=1e-5, rtol=1e-5)
    assert jnp.allclose(new_rn, ref_rn, atol=1e-5, rtol=1e-5)

    # Case 2: large per-channel slab -> two-phase streaming fallback path.
    N2, C2, H2, W2 = 2, 8, 256, 256
    x2 = jax.random.normal(k2, (N2, C2, H2, W2), dtype=jnp.float32)
    w2 = jnp.linspace(0.5, 1.5, C2, dtype=jnp.float32)
    rn2 = jnp.ones((C2,), dtype=jnp.float32)

    out2, new_rn2, _ = batchnorm2d_scaling_rms(
        x2, w2, rn2, eps=1e-5, momentum=0.1, training=True)
    out2, new_rn2 = jax.block_until_ready((out2, new_rn2))

    ref_out2, ref_rn2, _ = _reference(x2, w2, rn2, 1e-5, 0.1)
    assert jnp.allclose(out2, ref_out2, atol=1e-5, rtol=1e-4)
    assert jnp.allclose(new_rn2, ref_rn2, atol=1e-4, rtol=1e-4)

    print("KERNEL_OK")
</pallas_src>

<mosaic_0001>
module attributes {stable_mosaic.version = 11 : i64} {
  func.func @_fused_norm_scale_kernel(%arg0: i32, %arg1: memref<2x4x256xf32, #tpu.memory_space<vmem>>, %arg2: memref<4x1xf32, #tpu.memory_space<vmem>>, %arg3: memref<2x4x256xf32, #tpu.memory_space<vmem>>, %arg4: memref<4x1xf32, #tpu.memory_space<vmem>>) attributes {dimension_semantics = [#tpu.dimension_semantics<core_parallel>], iteration_bounds = array<i64: 1>, scalar_prefetch = 0 : i64, scratch_operands = 0 : i64, tpu.core_type = #tpu.core_type<tc>, window_params = [{transform_indices = @transform_0, window_bounds = array<i64: 2, 4, 256>}, {transform_indices = @transform_1, window_bounds = array<i64: 4, 1>}, {transform_indices = @transform_2, window_bounds = array<i64: 2, 4, 256>}, {transform_indices = @transform_3, window_bounds = array<i64: 4, 1>}]} {
    %c0 = arith.constant 0 : index
    %c0_0 = arith.constant 0 : index
    %c0_1 = arith.constant 0 : index
    %0 = vector.load %arg1[%c0, %c0_0, %c0_1] : memref<2x4x256xf32, #tpu.memory_space<vmem>>, vector<2x4x256xf32>
    %1 = arith.mulf %0, %0 : vector<2x4x256xf32>
    %cst = arith.constant dense<0.000000e+00> : vector<2x4xf32>
    %2 = vector.multi_reduction <add>, %1, %cst [2] : vector<2x4x256xf32> to vector<2x4xf32>
    %3 = vector.shape_cast %2 : vector<2x4xf32> to vector<2x4x1xf32>
    %cst_2 = arith.constant dense<0.000000e+00> : vector<4x1xf32>
    %4 = vector.multi_reduction <add>, %3, %cst_2 [0] : vector<2x4x1xf32> to vector<4x1xf32>
    %5 = math.sqrt %4 : vector<4x1xf32>
    %c0_3 = arith.constant 0 : index
    %c0_4 = arith.constant 0 : index
    %6 = vector.load %arg4[%c0_3, %c0_4] : memref<4x1xf32, #tpu.memory_space<vmem>>, vector<4x1xf32>
    tpu.vector_store %arg4[%c0_3, %c0_4], %5 {strides = array<i32>} : memref<4x1xf32, #tpu.memory_space<vmem>>, vector<4x1xf32>,
    %c0_5 = arith.constant 0 : index
    %c0_6 = arith.constant 0 : index
    %7 = vector.load %arg2[%c0_5, %c0_6] : memref<4x1xf32, #tpu.memory_space<vmem>>, vector<4x1xf32>
    %cst_7 = arith.constant 22.6274166 : f32
    %8 = vector.broadcast %cst_7 : f32 to vector<4x1xf32>
    %9 = arith.divf %5, %8 : vector<4x1xf32>
    %cst_8 = arith.constant 9.99999974E-6 : f32
    %10 = vector.broadcast %cst_8 : f32 to vector<4x1xf32>
    %11 = arith.addf %9, %10 : vector<4x1xf32>
    %12 = arith.divf %7, %11 : vector<4x1xf32>
    %13 = vector.shape_cast %12 : vector<4x1xf32> to vector<1x4x1xf32>
    %14 = vector.broadcast %13 : vector<1x4x1xf32> to vector<2x4x256xf32>
    %15 = arith.mulf %0, %14 : vector<2x4x256xf32>
    %c0_9 = arith.constant 0 : index
    %c0_10 = arith.constant 0 : index
    %c0_11 = arith.constant 0 : index
    %16 = vector.load %arg3[%c0_9, %c0_10, %c0_11] : memref<2x4x256xf32, #tpu.memory_space<vmem>>, vector<2x4x256xf32>
    tpu.vector_store %arg3[%c0_9, %c0_10, %c0_11], %15 {strides = array<i32>} : memref<2x4x256xf32, #tpu.memory_space<vmem>>, vector<2x4x256xf32>,
    return
  }
  func.func @transform_0(%arg0: i32) -> (i32, i32, i32) {
    %c0_i32 = arith.constant 0 : i32
    %c0_i32_0 = arith.constant 0 : i32
    %c0_i32_1 = arith.constant 0 : i32
    return %c0_i32, %arg0, %c0_i32_0 : i32, i32, i32
  }
  func.func @transform_1(%arg0: i32) -> (i32, i32) {
    %c0_i32 = arith.constant 0 : i32
    %c0_i32_0 = arith.constant 0 : i32
    return %arg0, %c0_i32 : i32, i32
  }
  func.func @transform_2(%arg0: i32) -> (i32, i32, i32) {
    %c0_i32 = arith.constant 0 : i32
    %c0_i32_0 = arith.constant 0 : i32
    %c0_i32_1 = arith.constant 0 : i32
    return %c0_i32, %arg0, %c0_i32_0 : i32, i32, i32
  }
  func.func @transform_3(%arg0: i32) -> (i32, i32) {
    %c0_i32 = arith.constant 0 : i32
    %c0_i32_0 = arith.constant 0 : i32
    return %arg0, %c0_i32 : i32, i32
  }
}

module attributes {stable_mosaic.version = 11 : i64} {
  func.func @_fused_norm_scale_kernel(%arg0: i32, %arg1: memref<2x4x256xf32, #tpu.memory_space<vmem>>, %arg2: memref<4x1xf32, #tpu.memory_space<vmem>>, %arg3: memref<2x4x256xf32, #tpu.memory_space<vmem>>, %arg4: memref<4x1xf32, #tpu.memory_space<vmem>>) attributes {dimension_semantics = [#tpu.dimension_semantics<parallel>], iteration_bounds = array<i64: 1>, scalar_prefetch = 0 : i64, scratch_operands = 0 : i64, tpu.core_type = #tpu.core_type<tc>, window_params = [{transform_indices = @transform_0, window_bounds = array<i64: 2, 4, 256>}, {transform_indices = @transform_1, window_bounds = array<i64: 4, 1>}, {transform_indices = @transform_2, window_bounds = array<i64: 2, 4, 256>}, {transform_indices = @transform_3, window_bounds = array<i64: 4, 1>}]} {
    %c0 = arith.constant 0 : index
    %c0_0 = arith.constant 0 : index
    %c0_1 = arith.constant 0 : index
    %0 = vector.load %arg1[%c0, %c0_0, %c0_1] : memref<2x4x256xf32, #tpu.memory_space<vmem>>, vector<2x4x256xf32>
    %1 = arith.mulf %0, %0 : vector<2x4x256xf32>
    %cst = arith.constant dense<0.000000e+00> : vector<2x4xf32>
    %2 = vector.multi_reduction <add>, %1, %cst [2] : vector<2x4x256xf32> to vector<2x4xf32>
    %3 = vector.shape_cast %2 : vector<2x4xf32> to vector<2x4x1xf32>
    %cst_2 = arith.constant dense<0.000000e+00> : vector<4x1xf32>
    %4 = vector.multi_reduction <add>, %3, %cst_2 [0] : vector<2x4x1xf32> to vector<4x1xf32>
    %5 = math.sqrt %4 : vector<4x1xf32>
    %c0_3 = arith.constant 0 : index
    %c0_4 = arith.constant 0 : index
    %6 = vector.load %arg4[%c0_3, %c0_4] : memref<4x1xf32, #tpu.memory_space<vmem>>, vector<4x1xf32>
    tpu.vector_store %arg4[%c0_3, %c0_4], %5 {strides = array<i32>} : memref<4x1xf32, #tpu.memory_space<vmem>>, vector<4x1xf32>,
    %c0_5 = arith.constant 0 : index
    %c0_6 = arith.constant 0 : index
    %7 = vector.load %arg2[%c0_5, %c0_6] : memref<4x1xf32, #tpu.memory_space<vmem>>, vector<4x1xf32>
    %cst_7 = arith.constant 22.6274166 : f32
    %8 = vector.broadcast %cst_7 : f32 to vector<4x1xf32>
    %9 = arith.divf %5, %8 : vector<4x1xf32>
    %cst_8 = arith.constant 9.99999974E-6 : f32
    %10 = vector.broadcast %cst_8 : f32 to vector<4x1xf32>
    %11 = arith.addf %9, %10 : vector<4x1xf32>
    %12 = arith.divf %7, %11 : vector<4x1xf32>
    %13 = vector.shape_cast %12 : vector<4x1xf32> to vector<1x4x1xf32>
    %14 = vector.broadcast %13 : vector<1x4x1xf32> to vector<2x4x256xf32>
    %15 = arith.mulf %0, %14 : vector<2x4x256xf32>
    %c0_9 = arith.constant 0 : index
    %c0_10 = arith.constant 0 : index
    %c0_11 = arith.constant 0 : index
    %16 = vector.load %arg3[%c0_9, %c0_10, %c0_11] : memref<2x4x256xf32, #tpu.memory_space<vmem>>, vector<2x4x256xf32>
    tpu.vector_store %arg3[%c0_9, %c0_10, %c0_11], %15 {strides = array<i32>} : memref<2x4x256xf32, #tpu.memory_space<vmem>>, vector<2x4x256xf32>,
    return
  }
  func.func @transform_0(%arg0: i32) -> (i32, i32, i32) {
    %c0_i32 = arith.constant 0 : i32
    %c0_i32_0 = arith.constant 0 : i32
    %c0_i32_1 = arith.constant 0 : i32
    return %c0_i32, %arg0, %c0_i32_0 : i32, i32, i32
  }
  func.func @transform_1(%arg0: i32) -> (i32, i32) {
    %c0_i32 = arith.constant 0 : i32
    %c0_i32_0 = arith.constant 0 : i32
    return %arg0, %c0_i32 : i32, i32
  }
  func.func @transform_2(%arg0: i32) -> (i32, i32, i32) {
    %c0_i32 = arith.constant 0 : i32
    %c0_i32_0 = arith.constant 0 : i32
    %c0_i32_1 = arith.constant 0 : i32
    return %c0_i32, %arg0, %c0_i32_0 : i32, i32, i32
  }
  func.func @transform_3(%arg0: i32) -> (i32, i32) {
    %c0_i32 = arith.constant 0 : i32
    %c0_i32_0 = arith.constant 0 : i32
    return %arg0, %c0_i32 : i32, i32
  }
}

</mosaic_0001>

<bundles_post_ra>
// kernel: tpu_custom_call.1
= control target key start
LH: loop header
LB: loop body
LE: loop exit
PB: predicated region body
PF: predicated region fallthrough
CT: control target
= control target key end

     0   :  { %s250_s12 = sld [smem:[#allocation0]]   ;;  %s287_s0 = inlined_call_operand.hbm [shape: f32[2,4,256], index: 0, kind: input, shape index: {}]   ;;  %s288_s1 = inlined_call_operand.vmem [shape: f32[4,1], index: 1, kind: input, shape index: {}]   ;;  %s289_s2 = inlined_call_operand.hbm [shape: f32[2,4,256], index: 2, kind: output, shape index: {0}]   ;;  %s290_s3 = inlined_call_operand.vmem [shape: f32[4,1], index: 3, kind: output, shape index: {1}]  }
   0x1   :  { %9 = vsyncpa [#allocation3], 0 }
   0x2   :  { %10 = vsyncpa [#allocation4], 0  ;;  %s224_s17 = smov [#allocation2]   ;;  %s178_s22 = scalar_lea.hbm %s287_s0, 256 }
   0x3   :  { %s19_s18 = sshll.u32 %s224_s17, 4  ;;  %s20_s18 = int_to_ptr.vmem [resolvable:$true] %s19_s18 }
   0x6   :  { %s162_s13 = sshll.u32 %s250_s12, 7 }
   0x7   :  { %s18_s16 = scalar_lea.hbm %s287_s0, %s162_s13 }
   0x8   :  { %s176_s19 = scalar_lea.hbm %s18_s16, 256 }
   0x9   :  { %p177_p0 = scmp.ne.s32.totalorder %s18_s16, %s176_s19  ;;  %p180_p1 = scmp.lt.s32.totalorder %s178_s22, %s176_s19 }
   0xb   :  { %p182_p2 = pnand %p180_p1, %p177_p0 }
   0xd   :  { %185 = shalt.err (!%p182_p2)
}
   0xe   :  { %s186_s23 = scalar_lea.vmem %s20_s18, 256  ;;  %p191_p4 = scmp.lt.s32.totalorder %s20_s18, %s20_s18 }
   0xf   :  { %p187_p3 = scmp.ne.s32.totalorder %s20_s18, %s186_s23  ;;  %p192_p5 = scmp.lt.s32.totalorder %s186_s23, %s186_s23 }
  0x11   :  { %p193_p6 = por %p192_p5, %p191_p4 }
  0x13   :  { %p194_p7 = pnand %p193_p6, %p187_p3 }
  0x15   :  { %197 = shalt.err (!%p194_p7)
}
  0x16   :  { %s225_s24 = smov 128   ;;  %s226_s25 = smov 8  }
  0x17   :  { %25 = dma.hbm_to_vmem [thread:$0]  %s18_s16, 256, %s20_s18, [#allocation3], %s225_s24, %s225_s24, %s226_s25  }
  0x18   :  { %220 = dma.done.wait [#allocation3], 256  }
  0x19   :  { %221 = vsyncadd [#allocation3], 4294967040  ;;  %v51_v0 = vld [vmem:[#allocation2] sm:$0xff]  ;;  %vm61_vm0 = vcmask 1043456   ;;  %v52_v1 = vld [vmem:[#allocation2 + $0x8] sm:$0xff]  ;;  %v227_v12 = vmov 0   ;;  %v97_v30 = vlaneseq }
  0x1a   :  { %v53_v2 = vmul.f32 %v51_v0, %v51_v0  ;;  %v54_v3 = vmul.f32 %v52_v1, %v52_v1  ;;  %170 = vset.pattern.permute.xlu1 %v227_v12  ;;  %171 = vset.pattern.permute.xlu0 %v227_v12  ;;  %vm82_vm2 = vcmask 3072   ;;  %v84_v25 = vld [vmem:[%s288_s1] sm:$0xf]  ;;  %v228_v28 = vmov 839922192   ;;  %s229_s29 = smov [#allocation5]   ;;  %s117_s1 = scalar_lea.hbm %s289_s2, %s162_s13 }
  0x1b   :  { %v95_v29 = vunpack.c.l.s4 %v228_v28  ;;  %v98_v32 = vshrl.u32 %v97_v30, 7  ;;  %s118_s30 = sshll.u32 %s229_s29, 4  ;;  %s119_s30 = int_to_ptr.vmem [resolvable:$true] %s118_s30 }
  0x1c   :  { %v57_v4 = vcombine.high %v53_v2, %v53_v2  ;;  %v62_v5 = vsel %vm61_vm0, %v53_v2, 0.0  ;;  %v58_v6 = vcombine.high %v54_v3, %v54_v3  ;;  %v67_v8 = vsel %vm61_vm0, %v54_v3, 0.0  ;;  %s198_s5 = scalar_lea.vmem %s119_s30, 256  ;;  %p203_p9 = scmp.lt.s32.totalorder %s119_s30, %s119_s30 }
  0x1d   :  { %v96_v31 = vunpack.c.0.s8 %v95_v29  ;;  %p199_p8 = scmp.ne.s32.totalorder %s119_s30, %s198_s5  ;;  %p204_p10 = scmp.lt.s32.totalorder %s198_s5, %s198_s5 }
  0x1e   :  { %v63_v7 = vsel %vm61_vm0, %v57_v4, 0.0  ;;  %v68_v9 = vsel %vm61_vm0, %v58_v6, 0.0 }
  0x1f   :  { %v64_v10 = vadd.f32 %v63_v7, %v62_v5  ;;  %v69_v11 = vadd.f32 %v68_v9, %v67_v8  ;;  %v99_v33 = vsub.s32 %v96_v31, %v98_v32  ;;  %p205_p11 = por %p204_p10, %p203_p9 }
  0x21   :  { %65 = vadd.xlane.f32.xlu0 %v64_v10  ;;  %p206_p12 = pnand %p205_p11, %p199_p8 }
  0x25   :  { %70 = vadd.xlane.f32.xlu0 %v69_v11 }
  0xaa   :  { %v66_v13 = vpop.xlane.xlu0 %65 }
  0xab   :  { %v72_v15 = vsel %vm61_vm0, %v66_v13, 0.0 }
  0xae   :  { %v71_v14 = vpop.xlane.xlu0 %70 }
  0xaf   :  { %v73_v16 = vsel %vm61_vm0, %v71_v14, 0.0 }
  0xb0   :  { %v74_v17 = vadd.f32 %v73_v16, %v72_v15 }
  0xb2   :  { %172 = vrsqrt.f32 %v74_v17  ;;  %vm77_vm1 = vcmp.eq.f32.partialorder %v74_v17, inf  ;;  %v80_v20 = vand.u32 2147483648, %v74_v17  ;;  %vm79_vm3 = vcmp.eq.f32.partialorder %v74_v17, 0.0 }
  0xbf   :  { %v173_v18 = vpop.eup %172 }
  0xc0   :  { %v76_v19 = vmul.f32 %v173_v18, %v74_v17 }
  0xc2   :  { %v78_v21 = vsel %vm77_vm1, %v74_v17, %v76_v19 }
  0xc3   :  { %v81_v22 = vsel %vm79_vm3, %v80_v20, %v78_v21 }
  0xc4   :  { %v86_v23 = vmul.f32 0.044194173, %v81_v22  ;;  %83 = vst.msk [vmem:[%s290_s3] sm:$0xf] %vm82_vm2, %v81_v22 }
  0xc6   :  { %v87_v24 = vadd.f32 1e-05, %v86_v23 }
  0xc8   :  { %174 = vrcp.f32 %v87_v24 }
  0xd5   :  { %v175_v26 = vpop.eup %174 }
  0xd6   :  { %v89_v27 = vmul.f32 %v175_v26, %v84_v25 }
  0xd8   :  { %92 = vperm.xlu1 %170, %v89_v27  }
 0x153   :  { %v93_v34 = vpop.permute.xlu1 %92 }
 0x154   :  { %v100_v35 = vrot.slane %v93_v34, %v99_v33 }
 0x156   :  { %v102_v36 = vmul.f32 %v100_v35, %v51_v0  ;;  %v103_v37 = vmul.f32 %v100_v35, %v52_v1 }
 0x158   :  { %104 = vst [vmem:[#allocation5] sm:$0xff] %v102_v36  ;;  %105 = vst [vmem:[#allocation5 + $0x8] sm:$0xff] %v103_v37 }
 0x159   :  { %209 = shalt.err (!%p206_p12)
}
 0x15a   :  { %s210_s6 = scalar_lea.hbm %s117_s1, 256  ;;  %s212_s9 = scalar_lea.hbm %s289_s2, 256 }
 0x15b   :  { %p211_p13 = scmp.ne.s32.totalorder %s117_s1, %s210_s6  ;;  %p214_p0 = scmp.lt.s32.totalorder %s212_s9, %s210_s6 }
 0x15d   :  { %p216_p1 = pnand %p214_p0, %p211_p13 }
 0x15f   :  { %219 = shalt.err (!%p216_p1)
}
 0x160   :  { %124 = dma.vmem_to_hbm [thread:$0]  %s119_s30, 256, %s117_s1, [#allocation4], %s225_s24, %s225_s24, %s226_s25  }
 0x161   :  { %222 = dma.done.wait [#allocation4], 256  }
 0x162   :  { %223 = vsyncadd [#allocation4], 4294967040 }
 0x163   :  { %136 = vsyncpa [#allocation3], 1 }
 0x164   :  { %137 = vsyncpa [#allocation4], 1 }

// kernel: tpu_custom_call.1
= control target key start
LH: loop header
LB: loop body
LE: loop exit
PB: predicated region body
PF: predicated region fallthrough
CT: control target
= control target key end

     0   :  { %9 = vsyncpa [#allocation3], 0  ;;  %s210_s0 = inlined_call_operand.hbm [shape: f32[2,4,256], index: 0, kind: input, shape index: {}]   ;;  %s211_s1 = inlined_call_operand.vmem [shape: f32[4,1], index: 1, kind: input, shape index: {}]   ;;  %s212_s2 = inlined_call_operand.hbm [shape: f32[2,4,256], index: 2, kind: output, shape index: {0}]   ;;  %s213_s3 = inlined_call_operand.vmem [shape: f32[4,1], index: 3, kind: output, shape index: {1}]  }
   0x1   :  { %10 = vsyncpa [#allocation4], 0  ;;  %s160_s12 = smov [#allocation2]  }
   0x2   :  { %s16_s13 = sshll.u32 %s160_s12, 4  ;;  %s17_s13 = int_to_ptr.vmem [resolvable:$true] %s16_s13 }
   0x3   :  { %s124_s14 = scalar_lea.vmem %s17_s13, 256  ;;  %p129_p1 = scmp.lt.s32.totalorder %s17_s13, %s17_s13 }
   0x4   :  { %p125_p0 = scmp.ne.s32.totalorder %s17_s13, %s124_s14  ;;  %p130_p2 = scmp.lt.s32.totalorder %s124_s14, %s124_s14 }
   0x6   :  { %p131_p3 = por %p130_p2, %p129_p1 }
   0x8   :  { %p132_p4 = pnand %p131_p3, %p125_p0 }
   0xa   :  { %135 = shalt.err (!%p132_p4)
}
   0xb   :  { %s161_s15 = smov 128   ;;  %s162_s16 = smov 8  }
   0xc   :  { %22 = dma.hbm_to_vmem [thread:$0]  %s210_s0, 256, %s17_s13, [#allocation3], %s161_s15, %s161_s15, %s162_s16  }
   0xd   :  { %156 = dma.done.wait [#allocation3], 256  }
   0xe   :  { %157 = vsyncadd [#allocation3], 4294967040  ;;  %v28_v0 = vld [vmem:[#allocation2] sm:$0xff]  ;;  %vm38_vm0 = vcmask 1043456   ;;  %v29_v1 = vld [vmem:[#allocation2 + $0x8] sm:$0xff]  ;;  %v163_v12 = vmov 0   ;;  %v74_v30 = vlaneseq }
   0xf   :  { %v30_v2 = vmul.f32 %v28_v0, %v28_v0  ;;  %v31_v3 = vmul.f32 %v29_v1, %v29_v1  ;;  %110 = vset.pattern.permute.xlu1 %v163_v12  ;;  %111 = vset.pattern.permute.xlu0 %v163_v12  ;;  %vm59_vm2 = vcmask 3072   ;;  %v61_v25 = vld [vmem:[%s211_s1] sm:$0xf]  ;;  %v164_v28 = vmov 839922192   ;;  %s165_s22 = smov [#allocation5]  }
  0x10   :  { %v72_v29 = vunpack.c.l.s4 %v164_v28  ;;  %v75_v32 = vshrl.u32 %v74_v30, 7  ;;  %s88_s23 = sshll.u32 %s165_s22, 4  ;;  %s89_s23 = int_to_ptr.vmem [resolvable:$true] %s88_s23 }
  0x11   :  { %v34_v4 = vcombine.high %v30_v2, %v30_v2  ;;  %v39_v5 = vsel %vm38_vm0, %v30_v2, 0.0  ;;  %v35_v6 = vcombine.high %v31_v3, %v31_v3  ;;  %v44_v8 = vsel %vm38_vm0, %v31_v3, 0.0  ;;  %p141_p6 = scmp.lt.s32.totalorder %s89_s23, %s89_s23 }
  0x12   :  { %v73_v31 = vunpack.c.0.s8 %v72_v29 }
  0x13   :  { %v40_v7 = vsel %vm38_vm0, %v34_v4, 0.0  ;;  %v45_v9 = vsel %vm38_vm0, %v35_v6, 0.0 }
  0x14   :  { %v41_v10 = vadd.f32 %v40_v7, %v39_v5  ;;  %v46_v11 = vadd.f32 %v45_v9, %v44_v8  ;;  %v76_v33 = vsub.s32 %v73_v31, %v75_v32 }
  0x16   :  { %42 = vadd.xlane.f32.xlu0 %v41_v10 }
  0x1a   :  { %47 = vadd.xlane.f32.xlu0 %v46_v11 }
  0x9f   :  { %v43_v13 = vpop.xlane.xlu0 %42 }
  0xa0   :  { %v49_v15 = vsel %vm38_vm0, %v43_v13, 0.0 }
  0xa3   :  { %v48_v14 = vpop.xlane.xlu0 %47 }
  0xa4   :  { %v50_v16 = vsel %vm38_vm0, %v48_v14, 0.0 }
  0xa5   :  { %v51_v17 = vadd.f32 %v50_v16, %v49_v15 }
  0xa7   :  { %112 = vrsqrt.f32 %v51_v17  ;;  %vm54_vm1 = vcmp.eq.f32.partialorder %v51_v17, inf  ;;  %v57_v20 = vand.u32 2147483648, %v51_v17  ;;  %vm56_vm3 = vcmp.eq.f32.partialorder %v51_v17, 0.0 }
  0xb4   :  { %v113_v18 = vpop.eup %112 }
  0xb5   :  { %v53_v19 = vmul.f32 %v113_v18, %v51_v17 }
  0xb7   :  { %v55_v21 = vsel %vm54_vm1, %v51_v17, %v53_v19 }
  0xb8   :  { %v58_v22 = vsel %vm56_vm3, %v57_v20, %v55_v21 }
  0xb9   :  { %v63_v23 = vmul.f32 0.044194173, %v58_v22  ;;  %60 = vst.msk [vmem:[%s213_s3] sm:$0xf] %vm59_vm2, %v58_v22  ;;  %s136_s3 = scalar_lea.vmem %s89_s23, 256 }
  0xba   :  { %p137_p5 = scmp.ne.s32.totalorder %s89_s23, %s136_s3  ;;  %p142_p7 = scmp.lt.s32.totalorder %s136_s3, %s136_s3 }
  0xbb   :  { %v64_v24 = vadd.f32 1e-05, %v63_v23 }
  0xbc   :  { %p143_p8 = por %p142_p7, %p141_p6 }
  0xbd   :  { %114 = vrcp.f32 %v64_v24 }
  0xbe   :  { %p144_p9 = pnand %p143_p8, %p137_p5 }
  0xca   :  { %v115_v26 = vpop.eup %114 }
  0xcb   :  { %v66_v27 = vmul.f32 %v115_v26, %v61_v25 }
  0xcd   :  { %69 = vperm.xlu1 %110, %v66_v27  }
 0x148   :  { %v70_v34 = vpop.permute.xlu1 %69 }
 0x149   :  { %v77_v35 = vrot.slane %v70_v34, %v76_v33 }
 0x14b   :  { %v79_v36 = vmul.f32 %v77_v35, %v28_v0  ;;  %v80_v37 = vmul.f32 %v77_v35, %v29_v1 }
 0x14d   :  { %81 = vst [vmem:[#allocation5] sm:$0xff] %v79_v36  ;;  %82 = vst [vmem:[#allocation5 + $0x8] sm:$0xff] %v80_v37 }
 0x14e   :  { %147 = shalt.err (!%p144_p9)
}
 0x14f   :  { %94 = dma.vmem_to_hbm [thread:$0]  %s89_s23, 256, %s212_s2, [#allocation4], %s161_s15, %s161_s15, %s162_s16  }
 0x150   :  { %158 = dma.done.wait [#allocation4], 256  }
 0x151   :  { %159 = vsyncadd [#allocation4], 4294967040 }
 0x152   :  { %102 = vsyncpa [#allocation3], 1 }
 0x153   :  { %103 = vsyncpa [#allocation4], 1 }

</bundles_post_ra>
